<compile_context>
chip_gen: v7x
topology: tpu7x:2x2x1
jax: 0.10.0
libtpu: 0.0.40
codegen_flags: <defaults>
</compile_context>

<pallas_src>
import functools

import jax
import jax.numpy as jnp
from jax.experimental import pallas as pl
from jax.experimental.pallas import tpu as pltpu

HIDDEN = 256      # hidden_layer_size in DeepQNetwork.__init__
OUT_PAD = 128     # lane-dense padded output width (requires action_size <= 128)
ROW_ALIGN = 16    # bf16 sublane packing -> keep weight-slab row offsets % 16 == 0


def _round_up(x, m):
    return ((x + m - 1) // m) * m


def _dqn_kernel(x_ref, w_ref, b_ref, out_ref, *, s_pad, hidden, out_pad):
    """Both 3-layer MLPs in one body (n=0: q_net, n=1: target_q_net).

    MXU matmuls use bf16 inputs with f32 accumulation; bias-add / ReLU run on
    the VPU in f32. All slab slices are static views (row offsets % 16,
    lane slices % 128).
    """
    xb = x_ref[...].astype(jnp.bfloat16)                       # [B, s_pad]
    for n in range(2):                                         # static unroll
        wn = w_ref.at[n]                                       # [s_pad+2H, H] bf16 view
        bn = b_ref.at[n]                                       # [8, H] f32 view

        w1 = wn[0:s_pad, :]                                    # [s_pad, H]
        w2 = wn[s_pad:s_pad + hidden, :]                       # [H, H]
        w3 = wn[s_pad + hidden:s_pad + 2 * hidden, 0:out_pad]  # [H, out_pad]
        b1 = bn[0:1, :]                                        # [1, H]
        b2 = bn[1:2, :]                                        # [1, H]
        b3 = bn[2:3, 0:out_pad]                                # [1, out_pad]

        h1 = jnp.dot(xb, w1, preferred_element_type=jnp.float32) + b1
        h1 = jnp.maximum(h1, 0.0).astype(jnp.bfloat16)         # [B, H]
        h2 = jnp.dot(h1, w2, preferred_element_type=jnp.float32) + b2
        h2 = jnp.maximum(h2, 0.0).astype(jnp.bfloat16)         # [B, H]
        q = jnp.dot(h2, w3, preferred_element_type=jnp.float32) + b3
        out_ref[n] = q.astype(out_ref.dtype)                   # [B, out_pad]


def deep_q_network_forward(state, w_slab, b_slab, action_size):
    """Equivalent of DeepQNetwork.forward: returns (q_net(state), target_q_net(state))."""
    assert action_size <= OUT_PAD, "OUT_PAD=128 assumes action_size <= 128"
    B, S = state.shape
    H = HIDDEN
    s_pad = w_slab.shape[1] - 2 * H

    # Pad state columns to match the zero-padded W1 rows (zeros contribute 0).
    if S < s_pad:
        state = jnp.pad(state, ((0, 0), (0, s_pad - S)))

    flops = 2 * 2 * B * (s_pad * H + H * H + H * OUT_PAD)
    bytes_accessed = (
        B * s_pad * 4
        + int(w_slab.size) * w_slab.dtype.itemsize
        + int(b_slab.size) * 4
        + 2 * B * OUT_PAD * 4
    )

    out = pl.pallas_call(
        functools.partial(_dqn_kernel, s_pad=s_pad, hidden=H, out_pad=OUT_PAD),
        out_shape=jax.ShapeDtypeStruct((2, B, OUT_PAD), jnp.float32),
        # Single invocation, whole arrays resident in VMEM (no grid / tiling).
        in_specs=[
            pl.BlockSpec(memory_space=pltpu.MemorySpace.VMEM),  # state  [B, s_pad] f32
            pl.BlockSpec(memory_space=pltpu.MemorySpace.VMEM),  # w_slab [2, s_pad+2H, H] bf16
            pl.BlockSpec(memory_space=pltpu.MemorySpace.VMEM),  # b_slab [2, 8, H] f32
        ],
        out_specs=pl.BlockSpec(memory_space=pltpu.MemorySpace.VMEM),
        cost_estimate=pl.CostEstimate(
            flops=flops, transcendentals=0, bytes_accessed=bytes_accessed),
    )(state, w_slab, b_slab)

    # Slice the zero-padded lanes back to the true action dimension.
    return out[0, :, :action_size], out[1, :, :action_size]


def init_linear(key, fan_in, fan_out):
    """PyTorch-style nn.Linear init: U(-1/sqrt(fan_in), +1/sqrt(fan_in)).

    Returns (W_T, b) with W_T transposed to [in, out] and b as [1, out].
    """
    kw, kb = jax.random.split(key)
    bound = 1.0 / jnp.sqrt(jnp.float32(fan_in))
    w = jax.random.uniform(kw, (fan_in, fan_out), jnp.float32, -bound, bound)
    b = jax.random.uniform(kb, (1, fan_out), jnp.float32, -bound, bound)
    return w, b


def init_qnet(key, state_size, action_size):
    k1, k2, k3 = jax.random.split(key, 3)
    w1, b1 = init_linear(k1, state_size, HIDDEN)
    w2, b2 = init_linear(k2, HIDDEN, HIDDEN)
    w3, b3 = init_linear(k3, HIDDEN, action_size)
    return (w1, b1, w2, b2, w3, b3)


def pack_params(q_params, target_params, state_size, weight_dtype=jnp.bfloat16):
    """Pack both networks' params into one weight slab + one bias slab.

    Weight slab [2, s_pad + 2*H, H] (dtype `weight_dtype`, default bf16):
      rows [0, s_pad)            : W1 (state rows zero-padded to s_pad)
      rows [s_pad, s_pad+H)      : W2
      rows [s_pad+H, s_pad+2H)   : W3 in the first OUT_PAD lanes (zero elsewhere)
    Bias slab [2, 8, H] (f32): row 0 = b1, row 1 = b2, row 2 = b3 (first lanes).
    """
    H = HIDDEN
    s_pad = max(ROW_ALIGN, _round_up(state_size, ROW_ALIGN))

    def pack_one(params):
        w1, b1, w2, b2, w3, b3 = params
        a = w3.shape[1]
        w = jnp.zeros((s_pad + 2 * H, H), jnp.float32)
        w = w.at[:state_size, :].set(w1)
        w = w.at[s_pad:s_pad + H, :].set(w2)
        w = w.at[s_pad + H:s_pad + 2 * H, :a].set(w3)
        b = jnp.zeros((8, H), jnp.float32)
        b = b.at[0, :].set(b1.reshape(-1))
        b = b.at[1, :].set(b2.reshape(-1))
        b = b.at[2, :a].set(b3.reshape(-1))
        return w, b

    wq, bq = pack_one(q_params)
    wt, bt = pack_one(target_params)
    w_slab = jnp.stack([wq, wt], axis=0).astype(weight_dtype)  # [2, s_pad+2H, H]
    b_slab = jnp.stack([bq, bt], axis=0)                       # [2, 8, H] f32
    return w_slab, b_slab


def _reference_mlp(state, params, weight_dtype=jnp.bfloat16):
    """Pure-JAX reference with the same weight-dtype / f32-accumulate numerics."""
    w1, b1, w2, b2, w3, b3 = params
    w1, w2, w3 = (w.astype(weight_dtype) for w in (w1, w2, w3))
    x = state.astype(weight_dtype)
    h1 = jnp.dot(x, w1, preferred_element_type=jnp.float32) + b1
    h1 = jnp.maximum(h1, 0.0).astype(weight_dtype)
    h2 = jnp.dot(h1, w2, preferred_element_type=jnp.float32) + b2
    h2 = jnp.maximum(h2, 0.0).astype(weight_dtype)
    return jnp.dot(h2, w3, preferred_element_type=jnp.float32) + b3


if __name__ == "__main__":
    # Small shapes consistent with the module: state vector in, Q-values out.
    B, STATE_SIZE, ACTION_SIZE = 8, 8, 4

    root = jax.random.PRNGKey(0)
    k_state, k_q, k_t = jax.random.split(root, 3)

    state = jax.random.normal(k_state, (B, STATE_SIZE), jnp.float32)
    q_params = init_qnet(k_q, STATE_SIZE, ACTION_SIZE)
    target_params = init_qnet(k_t, STATE_SIZE, ACTION_SIZE)
    w_slab, b_slab = pack_params(q_params, target_params, STATE_SIZE)

    q_vals, target_vals = deep_q_network_forward(state, w_slab, b_slab, ACTION_SIZE)
    q_vals = jax.block_until_ready(q_vals)
    target_vals = jax.block_until_ready(target_vals)

    # Correctness check against a pure-JAX reference with matching numerics.
    ref_q = _reference_mlp(state, q_params)[:, :ACTION_SIZE]
    ref_t = _reference_mlp(state, target_params)[:, :ACTION_SIZE]
    assert q_vals.shape == (B, ACTION_SIZE)
    assert target_vals.shape == (B, ACTION_SIZE)
    assert jnp.allclose(q_vals, ref_q, atol=1e-3, rtol=1e-3)
    assert jnp.allclose(target_vals, ref_t, atol=1e-3, rtol=1e-3)

    print("KERNEL_OK")
</pallas_src>

<mosaic_0001>
module attributes {stable_mosaic.version = 11 : i64} {
  func.func @_dqn_kernel(%arg0: memref<8x16xf32, #tpu.memory_space<vmem>>, %arg1: memref<2x528x256xbf16, #tpu.memory_space<vmem>>, %arg2: memref<2x8x256xf32, #tpu.memory_space<vmem>>, %arg3: memref<2x8x128xf32, #tpu.memory_space<vmem>>) attributes {dimension_semantics = [], scalar_prefetch = 0 : i64, scratch_operands = 0 : i64, tpu.core_type = #tpu.core_type<tc>} {
    %c0 = arith.constant 0 : index
    %c0_0 = arith.constant 0 : index
    %0 = vector.load %arg0[%c0, %c0_0] : memref<8x16xf32, #tpu.memory_space<vmem>>, vector<8x16xf32>
    %1 = arith.truncf %0 : vector<8x16xf32> to vector<8x16xbf16>
    %c0_i32 = arith.constant 0 : i32
    %c0_i32_1 = arith.constant 0 : i32
    %c0_i32_2 = arith.constant 0 : i32
    %2 = tpu.memref_slice %arg1[%c0_i32, %c0_i32_1, %c0_i32_2] : memref<2x528x256xbf16, #tpu.memory_space<vmem>> -> memref<1x528x256xbf16, #tpu.memory_space<vmem>>
    %3 = tpu.memref_squeeze %2 : memref<1x528x256xbf16, #tpu.memory_space<vmem>> -> memref<528x256xbf16, #tpu.memory_space<vmem>>
    %c0_3 = arith.constant 0 : index
    %c0_4 = arith.constant 0 : index
    %4 = vector.load %3[%c0_3, %c0_4] : memref<528x256xbf16, #tpu.memory_space<vmem>>, vector<16x256xbf16>
    %c0_i32_5 = arith.constant 0 : i32
    %c0_i32_6 = arith.constant 0 : i32
    %c0_i32_7 = arith.constant 0 : i32
    %5 = tpu.memref_slice %arg1[%c0_i32_5, %c0_i32_6, %c0_i32_7] : memref<2x528x256xbf16, #tpu.memory_space<vmem>> -> memref<1x528x256xbf16, #tpu.memory_space<vmem>>
    %6 = tpu.memref_squeeze %5 : memref<1x528x256xbf16, #tpu.memory_space<vmem>> -> memref<528x256xbf16, #tpu.memory_space<vmem>>
    %c16 = arith.constant 16 : index
    %c0_8 = arith.constant 0 : index
    %7 = vector.load %6[%c16, %c0_8] : memref<528x256xbf16, #tpu.memory_space<vmem>>, vector<256x256xbf16>
    %c0_i32_9 = arith.constant 0 : i32
    %c0_i32_10 = arith.constant 0 : i32
    %c0_i32_11 = arith.constant 0 : i32
    %8 = tpu.memref_slice %arg1[%c0_i32_9, %c0_i32_10, %c0_i32_11] : memref<2x528x256xbf16, #tpu.memory_space<vmem>> -> memref<1x528x256xbf16, #tpu.memory_space<vmem>>
    %9 = tpu.memref_squeeze %8 : memref<1x528x256xbf16, #tpu.memory_space<vmem>> -> memref<528x256xbf16, #tpu.memory_space<vmem>>
    %c272 = arith.constant 272 : index
    %c0_12 = arith.constant 0 : index
    %10 = vector.load %9[%c272, %c0_12] : memref<528x256xbf16, #tpu.memory_space<vmem>>, vector<256x128xbf16>
    %c0_i32_13 = arith.constant 0 : i32
    %c0_i32_14 = arith.constant 0 : i32
    %c0_i32_15 = arith.constant 0 : i32
    %11 = tpu.memref_slice %arg2[%c0_i32_13, %c0_i32_14, %c0_i32_15] : memref<2x8x256xf32, #tpu.memory_space<vmem>> -> memref<1x8x256xf32, #tpu.memory_space<vmem>>
    %12 = tpu.memref_squeeze %11 : memref<1x8x256xf32, #tpu.memory_space<vmem>> -> memref<8x256xf32, #tpu.memory_space<vmem>>
    %c0_16 = arith.constant 0 : index
    %c0_17 = arith.constant 0 : index
    %13 = vector.load %12[%c0_16, %c0_17] : memref<8x256xf32, #tpu.memory_space<vmem>>, vector<1x256xf32>
    %c0_i32_18 = arith.constant 0 : i32
    %c0_i32_19 = arith.constant 0 : i32
    %c0_i32_20 = arith.constant 0 : i32
    %14 = tpu.memref_slice %arg2[%c0_i32_18, %c0_i32_19, %c0_i32_20] : memref<2x8x256xf32, #tpu.memory_space<vmem>> -> memref<1x8x256xf32, #tpu.memory_space<vmem>>
    %15 = tpu.memref_squeeze %14 : memref<1x8x256xf32, #tpu.memory_space<vmem>> -> memref<8x256xf32, #tpu.memory_space<vmem>>
    %c1 = arith.constant 1 : index
    %c0_21 = arith.constant 0 : index
    %16 = vector.load %15[%c1, %c0_21] : memref<8x256xf32, #tpu.memory_space<vmem>>, vector<1x256xf32>
    %c0_i32_22 = arith.constant 0 : i32
    %c0_i32_23 = arith.constant 0 : i32
    %c0_i32_24 = arith.constant 0 : i32
    %17 = tpu.memref_slice %arg2[%c0_i32_22, %c0_i32_23, %c0_i32_24] : memref<2x8x256xf32, #tpu.memory_space<vmem>> -> memref<1x8x256xf32, #tpu.memory_space<vmem>>
    %18 = tpu.memref_squeeze %17 : memref<1x8x256xf32, #tpu.memory_space<vmem>> -> memref<8x256xf32, #tpu.memory_space<vmem>>
    %c2 = arith.constant 2 : index
    %c0_25 = arith.constant 0 : index
    %19 = vector.load %18[%c2, %c0_25] : memref<8x256xf32, #tpu.memory_space<vmem>>, vector<1x128xf32>
    %cst = arith.constant dense<0.000000e+00> : vector<8x256xf32>
    %20 = tpu.matmul %1, %4, %cst {dimension_numbers = #tpu.dot_dimension_numbers<[1], [0], [0], [1], [0, 0, 1, 1], [], []>} : vector<8x16xbf16>, vector<16x256xbf16>, vector<8x256xf32> -> vector<8x256xf32>
    %21 = vector.broadcast %13 : vector<1x256xf32> to vector<8x256xf32>
    %22 = arith.addf %20, %21 : vector<8x256xf32>
    %cst_26 = arith.constant 0.000000e+00 : f32
    %23 = vector.broadcast %cst_26 : f32 to vector<8x256xf32>
    %24 = arith.maximumf %22, %23 : vector<8x256xf32>
    %25 = arith.truncf %24 : vector<8x256xf32> to vector<8x256xbf16>
    %cst_27 = arith.constant dense<0.000000e+00> : vector<8x256xf32>
    %26 = tpu.matmul %25, %7, %cst_27 {dimension_numbers = #tpu.dot_dimension_numbers<[1], [0], [0], [1], [0, 0, 1, 1], [], []>} : vector<8x256xbf16>, vector<256x256xbf16>, vector<8x256xf32> -> vector<8x256xf32>
    %27 = vector.broadcast %16 : vector<1x256xf32> to vector<8x256xf32>
    %28 = arith.addf %26, %27 : vector<8x256xf32>
    %cst_28 = arith.constant 0.000000e+00 : f32
    %29 = vector.broadcast %cst_28 : f32 to vector<8x256xf32>
    %30 = arith.maximumf %28, %29 : vector<8x256xf32>
    %31 = arith.truncf %30 : vector<8x256xf32> to vector<8x256xbf16>
    %cst_29 = arith.constant dense<0.000000e+00> : vector<8x128xf32>
    %32 = tpu.matmul %31, %10, %cst_29 {dimension_numbers = #tpu.dot_dimension_numbers<[1], [0], [0], [1], [0, 0, 1, 1], [], []>} : vector<8x256xbf16>, vector<256x128xbf16>, vector<8x128xf32> -> vector<8x128xf32>
    %33 = vector.broadcast %19 : vector<1x128xf32> to vector<8x128xf32>
    %34 = arith.addf %32, %33 : vector<8x128xf32>
    %c0_30 = arith.constant 0 : index
    %c0_31 = arith.constant 0 : index
    %c0_32 = arith.constant 0 : index
    %35 = vector.load %arg3[%c0_30, %c0_31, %c0_32] : memref<2x8x128xf32, #tpu.memory_space<vmem>>, vector<1x8x128xf32>
    %36 = vector.shape_cast %35 : vector<1x8x128xf32> to vector<8x128xf32>
    %37 = vector.shape_cast %34 : vector<8x128xf32> to vector<1x8x128xf32>
    tpu.vector_store %arg3[%c0_30, %c0_31, %c0_32], %37 {strides = array<i32>} : memref<2x8x128xf32, #tpu.memory_space<vmem>>, vector<1x8x128xf32>,
    %c1_i32 = arith.constant 1 : i32
    %c0_i32_33 = arith.constant 0 : i32
    %c0_i32_34 = arith.constant 0 : i32
    %38 = tpu.memref_slice %arg1[%c1_i32, %c0_i32_33, %c0_i32_34] : memref<2x528x256xbf16, #tpu.memory_space<vmem>> -> memref<1x528x256xbf16, #tpu.memory_space<vmem>>
    %39 = tpu.memref_squeeze %38 : memref<1x528x256xbf16, #tpu.memory_space<vmem>> -> memref<528x256xbf16, #tpu.memory_space<vmem>>
    %c0_35 = arith.constant 0 : index
    %c0_36 = arith.constant 0 : index
    %40 = vector.load %39[%c0_35, %c0_36] : memref<528x256xbf16, #tpu.memory_space<vmem>>, vector<16x256xbf16>
    %c1_i32_37 = arith.constant 1 : i32
    %c0_i32_38 = arith.constant 0 : i32
    %c0_i32_39 = arith.constant 0 : i32
    %41 = tpu.memref_slice %arg1[%c1_i32_37, %c0_i32_38, %c0_i32_39] : memref<2x528x256xbf16, #tpu.memory_space<vmem>> -> memref<1x528x256xbf16, #tpu.memory_space<vmem>>
    %42 = tpu.memref_squeeze %41 : memref<1x528x256xbf16, #tpu.memory_space<vmem>> -> memref<528x256xbf16, #tpu.memory_space<vmem>>
    %c16_40 = arith.constant 16 : index
    %c0_41 = arith.constant 0 : index
    %43 = vector.load %42[%c16_40, %c0_41] : memref<528x256xbf16, #tpu.memory_space<vmem>>, vector<256x256xbf16>
    %c1_i32_42 = arith.constant 1 : i32
    %c0_i32_43 = arith.constant 0 : i32
    %c0_i32_44 = arith.constant 0 : i32
    %44 = tpu.memref_slice %arg1[%c1_i32_42, %c0_i32_43, %c0_i32_44] : memref<2x528x256xbf16, #tpu.memory_space<vmem>> -> memref<1x528x256xbf16, #tpu.memory_space<vmem>>
    %45 = tpu.memref_squeeze %44 : memref<1x528x256xbf16, #tpu.memory_space<vmem>> -> memref<528x256xbf16, #tpu.memory_space<vmem>>
    %c272_45 = arith.constant 272 : index
    %c0_46 = arith.constant 0 : index
    %46 = vector.load %45[%c272_45, %c0_46] : memref<528x256xbf16, #tpu.memory_space<vmem>>, vector<256x128xbf16>
    %c1_i32_47 = arith.constant 1 : i32
    %c0_i32_48 = arith.constant 0 : i32
    %c0_i32_49 = arith.constant 0 : i32
    %47 = tpu.memref_slice %arg2[%c1_i32_47, %c0_i32_48, %c0_i32_49] : memref<2x8x256xf32, #tpu.memory_space<vmem>> -> memref<1x8x256xf32, #tpu.memory_space<vmem>>
    %48 = tpu.memref_squeeze %47 : memref<1x8x256xf32, #tpu.memory_space<vmem>> -> memref<8x256xf32, #tpu.memory_space<vmem>>
    %c0_50 = arith.constant 0 : index
    %c0_51 = arith.constant 0 : index
    %49 = vector.load %48[%c0_50, %c0_51] : memref<8x256xf32, #tpu.memory_space<vmem>>, vector<1x256xf32>
    %c1_i32_52 = arith.constant 1 : i32
    %c0_i32_53 = arith.constant 0 : i32
    %c0_i32_54 = arith.constant 0 : i32
    %50 = tpu.memref_slice %arg2[%c1_i32_52, %c0_i32_53, %c0_i32_54] : memref<2x8x256xf32, #tpu.memory_space<vmem>> -> memref<1x8x256xf32, #tpu.memory_space<vmem>>
    %51 = tpu.memref_squeeze %50 : memref<1x8x256xf32, #tpu.memory_space<vmem>> -> memref<8x256xf32, #tpu.memory_space<vmem>>
    %c1_55 = arith.constant 1 : index
    %c0_56 = arith.constant 0 : index
    %52 = vector.load %51[%c1_55, %c0_56] : memref<8x256xf32, #tpu.memory_space<vmem>>, vector<1x256xf32>
    %c1_i32_57 = arith.constant 1 : i32
    %c0_i32_58 = arith.constant 0 : i32
    %c0_i32_59 = arith.constant 0 : i32
    %53 = tpu.memref_slice %arg2[%c1_i32_57, %c0_i32_58, %c0_i32_59] : memref<2x8x256xf32, #tpu.memory_space<vmem>> -> memref<1x8x256xf32, #tpu.memory_space<vmem>>
    %54 = tpu.memref_squeeze %53 : memref<1x8x256xf32, #tpu.memory_space<vmem>> -> memref<8x256xf32, #tpu.memory_space<vmem>>
    %c2_60 = arith.constant 2 : index
    %c0_61 = arith.constant 0 : index
    %55 = vector.load %54[%c2_60, %c0_61] : memref<8x256xf32, #tpu.memory_space<vmem>>, vector<1x128xf32>
    %cst_62 = arith.constant dense<0.000000e+00> : vector<8x256xf32>
    %56 = tpu.matmul %1, %40, %cst_62 {dimension_numbers = #tpu.dot_dimension_numbers<[1], [0], [0], [1], [0, 0, 1, 1], [], []>} : vector<8x16xbf16>, vector<16x256xbf16>, vector<8x256xf32> -> vector<8x256xf32>
    %57 = vector.broadcast %49 : vector<1x256xf32> to vector<8x256xf32>
    %58 = arith.addf %56, %57 : vector<8x256xf32>
    %cst_63 = arith.constant 0.000000e+00 : f32
    %59 = vector.broadcast %cst_63 : f32 to vector<8x256xf32>
    %60 = arith.maximumf %58, %59 : vector<8x256xf32>
    %61 = arith.truncf %60 : vector<8x256xf32> to vector<8x256xbf16>
    %cst_64 = arith.constant dense<0.000000e+00> : vector<8x256xf32>
    %62 = tpu.matmul %61, %43, %cst_64 {dimension_numbers = #tpu.dot_dimension_numbers<[1], [0], [0], [1], [0, 0, 1, 1], [], []>} : vector<8x256xbf16>, vector<256x256xbf16>, vector<8x256xf32> -> vector<8x256xf32>
    %63 = vector.broadcast %52 : vector<1x256xf32> to vector<8x256xf32>
    %64 = arith.addf %62, %63 : vector<8x256xf32>
    %cst_65 = arith.constant 0.000000e+00 : f32
    %65 = vector.broadcast %cst_65 : f32 to vector<8x256xf32>
    %66 = arith.maximumf %64, %65 : vector<8x256xf32>
    %67 = arith.truncf %66 : vector<8x256xf32> to vector<8x256xbf16>
    %cst_66 = arith.constant dense<0.000000e+00> : vector<8x128xf32>
    %68 = tpu.matmul %67, %46, %cst_66 {dimension_numbers = #tpu.dot_dimension_numbers<[1], [0], [0], [1], [0, 0, 1, 1], [], []>} : vector<8x256xbf16>, vector<256x128xbf16>, vector<8x128xf32> -> vector<8x128xf32>
    %69 = vector.broadcast %55 : vector<1x128xf32> to vector<8x128xf32>
    %70 = arith.addf %68, %69 : vector<8x128xf32>
    %c1_67 = arith.constant 1 : index
    %c0_68 = arith.constant 0 : index
    %c0_69 = arith.constant 0 : index
    %71 = vector.load %arg3[%c1_67, %c0_68, %c0_69] : memref<2x8x128xf32, #tpu.memory_space<vmem>>, vector<1x8x128xf32>
    %72 = vector.shape_cast %71 : vector<1x8x128xf32> to vector<8x128xf32>
    %73 = vector.shape_cast %70 : vector<8x128xf32> to vector<1x8x128xf32>
    tpu.vector_store %arg3[%c1_67, %c0_68, %c0_69], %73 {strides = array<i32>} : memref<2x8x128xf32, #tpu.memory_space<vmem>>, vector<1x8x128xf32>,
    return
  }
}

</mosaic_0001>

<bundles_post_ra>
// kernel: tpu_custom_call.1
= control target key start
LH: loop header
LB: loop body
LE: loop exit
PB: predicated region body
PF: predicated region fallthrough
CT: control target
= control target key end

     0   :  { %8 = vsyncpa [#allocation3], 0  ;;  %s1547_s0 = inlined_call_operand.hbm [shape: f32[8,16], index: 0, kind: input, shape index: {}]   ;;  %s1548_s1 = inlined_call_operand.hbm [shape: bf16[2,528,256], index: 1, kind: input, shape index: {}]   ;;  %s1549_s2 = inlined_call_operand.hbm [shape: f32[2,8,256], index: 2, kind: input, shape index: {}]   ;;  %s1550_s3 = inlined_call_operand.hbm [shape: f32[2,8,128], index: 3, kind: output, shape index: {}]  }
   0x1   :  { %9 = vsyncpa [#allocation6], 0 }
   0x2   :  { %10 = vsyncpa [#allocation4], 0  ;;  %s1444_s12 = smov [#allocation5]   ;;  %s1350_s16 = scalar_lea.hbm %s1548_s1, 16896 }
   0x3   :  { %s26_s13 = sshll.u32 %s1444_s12, 4  ;;  %p1351_p0 = scmp.ne.s32.totalorder %s1548_s1, %s1350_s16  ;;  %s27_s13 = int_to_ptr.vmem [resolvable:$true] %s26_s13 }
   0x4   :  { %p1354_p1 = scmp.lt.u32.totalorder %s1350_s16, %s1548_s1 }
   0x6   :  { %p1356_p2 = pnand %p1354_p1, %p1351_p0 }
   0x8   :  { %1359 = shalt.err (!%p1356_p2)
}
   0x9   :  { %s1360_s21 = scalar_lea.vmem %s27_s13, 16896  ;;  %p1365_p4 = scmp.lt.s32.totalorder %s27_s13, %s27_s13 }
   0xa   :  { %p1361_p3 = scmp.ne.s32.totalorder %s27_s13, %s1360_s21  ;;  %p1366_p5 = scmp.lt.s32.totalorder %s1360_s21, %s1360_s21 }
   0xc   :  { %p1367_p6 = por %p1366_p5, %p1365_p4 }
   0xe   :  { %p1368_p7 = pnand %p1367_p6, %p1361_p3 }
  0x10   :  { %1371 = shalt.err (!%p1368_p7)
}
  0x11   :  { %s1445_s22 = smov 128   ;;  %s1446_s23 = smov 8  }
  0x12   :  { %32 = dma.hbm_to_vmem [thread:$0]  %s1548_s1, 16896, %s27_s13, [#allocation6], %s1445_s22, %s1445_s22, %s1446_s23  }
  0x13   :  { %s1447_s26 = smov [#allocation2]   ;;  %s1448_s28 = smov [#allocation7]  }
  0x14   :  { %s17_s27 = sshll.u32 %s1447_s26, 4  ;;  %s38_s29 = sshll.u32 %s1448_s28, 4  ;;  %s18_s27 = int_to_ptr.vmem [resolvable:$true] %s17_s27  ;;  %s39_s29 = int_to_ptr.vmem [resolvable:$true] %s38_s29 }
  0x15   :  { %s1372_s5 = scalar_lea.hbm %s1547_s0, 128 }
  0x16   :  { %p1373_p8 = scmp.ne.s32.totalorder %s1547_s0, %s1372_s5  ;;  %p1376_p9 = scmp.lt.u32.totalorder %s1372_s5, %s1547_s0 }
  0x18   :  { %p1378_p10 = pnand %p1376_p9, %p1373_p8 }
  0x1a   :  { %1381 = shalt.err (!%p1378_p10)
}
  0x1b   :  { %s1382_s1 = scalar_lea.vmem %s18_s27, 128  ;;  %p1387_p12 = scmp.lt.s32.totalorder %s18_s27, %s18_s27 }
  0x1c   :  { %p1383_p11 = scmp.ne.s32.totalorder %s18_s27, %s1382_s1  ;;  %p1388_p13 = scmp.lt.s32.totalorder %s1382_s1, %s1382_s1 }
  0x1e   :  { %p1389_p0 = por %p1388_p13, %p1387_p12 }
  0x20   :  { %p1390_p1 = pnand %p1389_p0, %p1383_p11 }
  0x22   :  { %1393 = shalt.err (!%p1390_p1)
}
  0x23   :  { %20 = dma.hbm_to_vmem [thread:$0]  %s1547_s0, 128, %s18_s27, [#allocation3]  }
  0x24   :  { %s1394_s14 = scalar_lea.hbm %s1549_s2, 512 }
  0x25   :  { %p1395_p2 = scmp.ne.s32.totalorder %s1549_s2, %s1394_s14  ;;  %p1398_p3 = scmp.lt.u32.totalorder %s1394_s14, %s1549_s2 }
  0x27   :  { %p1400_p4 = pnand %p1398_p3, %p1395_p2 }
  0x29   :  { %1403 = shalt.err (!%p1400_p4)
}
  0x2a   :  { %s1404_s19 = scalar_lea.vmem %s39_s29, 512  ;;  %p1409_p6 = scmp.lt.s32.totalorder %s39_s29, %s39_s29 }
  0x2b   :  { %p1405_p5 = scmp.ne.s32.totalorder %s39_s29, %s1404_s19  ;;  %p1410_p7 = scmp.lt.s32.totalorder %s1404_s19, %s1404_s19 }
  0x2d   :  { %p1411_p8 = por %p1410_p7, %p1409_p6 }
  0x2f   :  { %p1412_p9 = pnand %p1411_p8, %p1405_p5 }
  0x31   :  { %1415 = shalt.err (!%p1412_p9)
}
  0x32   :  { %s1449_s0 = smov 256   ;;  %s1450_s20 = smov 16  }
  0x33   :  { %44 = dma.hbm_to_vmem [thread:$0]  %s1549_s2, 512, %s39_s29, [#allocation6], %s1449_s0, %s1449_s0, %s1450_s20  }
  0x34   :  { %1438 = dma.done.wait [#allocation3], 128  }
  0x35   :  { %1439 = vsyncadd [#allocation3], 4294967168 }
  0x36   :  { %1440 = dma.done.wait [#allocation6], 17408  }
  0x37   :  { %1441 = vsyncadd [#allocation6], 4294949888  ;;  %v1451_v0 = vmov 0   ;;  %v1216_v1 = vld [vmem:[#allocation5 + $0x4] ss:$8 sps:$4 sm:$0xff]   ;;  %v55_v3 = vld [vmem:[#allocation2] sm:$0xff]  ;;  %v128_v49 = vlaneseq }
  0x38   :  { %184 = vmatprep.mubr.bf16.mxu1 %v1451_v0  ;;  %v1218_v2 = vld [vmem:[#allocation5] ss:$8 sps:$4 sm:$0xff]   ;;  %152 = vmatprep.subr.bf16.mxu1 %v1216_v1  ;;  %v1513_v4 = vpack.c.bf16 %v55_v3, %v55_v3  ;;  %v1221_v5 = vld [vmem:[#allocation5 + $0x14] ss:$8 sps:$4 sm:$0xff]   ;;  %vm148_vm0 = vcmask 130048   ;;  %s1452_s2 = smov [#allocation8]  }
  0x39   :  { %153 = vmatpush1.bf16.msra.mxu1 %v1218_v2  ;;  %v1219_v6 = vld [vmem:[#allocation5 + $0x10] ss:$8 sps:$4 sm:$0xff]   ;;  %v1224_v7 = vld [vmem:[#allocation5 + $0x24] ss:$8 sps:$4 sm:$0xff]   ;;  %v1222_v8 = vld [vmem:[#allocation5 + $0x20] ss:$8 sps:$4 sm:$0xff]  }
  0x3a   :  { %368 = vmatprep.subr.bf16.mxu1 %v1221_v5  ;;  %v1227_v9 = vld [vmem:[#allocation5 + $0x34] ss:$8 sps:$4 sm:$0xff]   ;;  %v1225_v10 = vld [vmem:[#allocation5 + $0x30] ss:$8 sps:$4 sm:$0xff]   ;;  %v1230_v11 = vld [vmem:[#allocation5 + $0x44] ss:$8 sps:$4 sm:$0xff]  }
  0x3b   :  { %v1228_v12 = vld [vmem:[#allocation5 + $0x40] ss:$8 sps:$4 sm:$0xff]   ;;  %v1233_v13 = vld [vmem:[#allocation5 + $0x54] ss:$8 sps:$4 sm:$0xff]   ;;  %v1231_v14 = vld [vmem:[#allocation5 + $0x50] ss:$8 sps:$4 sm:$0xff]  }
  0x3c   :  { %1063 = vmatmul.mubr.msk.bf16.vlgmr.msra.gmra.mrb[0].mxu1 %vm148_vm0, %v1513_v4  ;;  %v1236_v15 = vld [vmem:[#allocation5 + $0x64] ss:$8 sps:$4 sm:$0xff]   ;;  %v1234_v16 = vld [vmem:[#allocation5 + $0x60] ss:$8 sps:$4 sm:$0xff]   ;;  %v1239_v17 = vld [vmem:[#allocation5 + $0x74] ss:$8 sps:$4 sm:$0xff]  }
  0x3d   :  { %369 = vmatpush1.bf16.msra.mxu1 %v1219_v6  ;;  %v1237_v18 = vld [vmem:[#allocation5 + $0x70] ss:$8 sps:$4 sm:$0xff]   ;;  %v1242_v19 = vld [vmem:[#allocation5 + $0x84] ss:$8 sps:$4 sm:$0xff]   ;;  %v1240_v20 = vld [vmem:[#allocation5 + $0x80] ss:$8 sps:$4 sm:$0xff]  }
  0x3e   :  { %370 = vmatprep.subr.bf16.mxu1 %v1224_v7  ;;  %v1245_v21 = vld [vmem:[#allocation5 + $0x94] ss:$8 sps:$4 sm:$0xff]   ;;  %v1243_v22 = vld [vmem:[#allocation5 + $0x90] ss:$8 sps:$4 sm:$0xff]   ;;  %v1248_v23 = vld [vmem:[#allocation5 + $0xa4] ss:$8 sps:$4 sm:$0xff]  }
  0x3f   :  { %v1246_v24 = vld [vmem:[#allocation5 + $0xa0] ss:$8 sps:$4 sm:$0xff]   ;;  %v1251_v25 = vld [vmem:[#allocation5 + $0xb4] ss:$8 sps:$4 sm:$0xff]   ;;  %v1249_v26 = vld [vmem:[#allocation5 + $0xb0] ss:$8 sps:$4 sm:$0xff]  }
  0x40   :  { %v1254_v27 = vld [vmem:[#allocation5 + $0xc4] ss:$8 sps:$4 sm:$0xff]   ;;  %v1252_v28 = vld [vmem:[#allocation5 + $0xc0] ss:$8 sps:$4 sm:$0xff]   ;;  %v1257_v29 = vld [vmem:[#allocation5 + $0xd4] ss:$8 sps:$4 sm:$0xff]  }
  0x41   :  { %371 = vmatpush1.bf16.msra.mxu1 %v1222_v8  ;;  %v1255_v30 = vld [vmem:[#allocation5 + $0xd0] ss:$8 sps:$4 sm:$0xff]   ;;  %v1260_v31 = vld [vmem:[#allocation5 + $0xe4] ss:$8 sps:$4 sm:$0xff]   ;;  %v1258_v32 = vld [vmem:[#allocation5 + $0xe0] ss:$8 sps:$4 sm:$0xff]  }
  0x42   :  { %372 = vmatprep.subr.bf16.mxu1 %v1227_v9  ;;  %v1263_v33 = vld [vmem:[#allocation5 + $0xf4] ss:$8 sps:$4 sm:$0xff]   ;;  %v1261_v34 = vld [vmem:[#allocation5 + $0xf0] ss:$8 sps:$4 sm:$0xff]   ;;  %v1266_v35 = vld [vmem:[#allocation5 + $0x104] ss:$8 sps:$4 sm:$0xff]  }
  0x43   :  { %v1264_v36 = vld [vmem:[#allocation5 + $0x100] ss:$8 sps:$4 sm:$0xff]   ;;  %v1267_v37 = vld [vmem:[#allocation5 + $0x190] ss:$8 sps:$4 sm:$0xff]   ;;  %v129_v50 = vshrl.u32 %v128_v49, 7  ;;  %s1047_s25 = sshll.u32 %s1452_s2, 4  ;;  %s1048_s25 = int_to_ptr.vmem [resolvable:$true] %s1047_s25 }
  0x44   :  { %v1268_v38 = vld [vmem:[#allocation5 + $0x110] ss:$8 sps:$4 sm:$0xff]   ;;  %v1269_v39 = vld [vmem:[#allocation5 + $0x1a0] ss:$8 sps:$4 sm:$0xff]   ;;  %1163 = vmatprep.subr.bf16.mxu0 %v1267_v37  ;;  %v1285_v8 = vld [vmem:[#allocation5 + $0x214] ss:$8 sps:$4 sm:$0xff]   ;;  %p1421_p11 = scmp.lt.s32.totalorder %s1048_s25, %s1048_s25 }
  0x45   :  { %373 = vmatpush1.bf16.msra.mxu1 %v1225_v10  ;;  %1164 = vmatpush3.bf16.msra.mxu0 %v1268_v38  ;;  %v1270_v40 = vld [vmem:[#allocation5 + $0x120] ss:$8 sps:$4 sm:$0xff]   ;;  %v1271_v41 = vld [vmem:[#allocation5 + $0x1b0] ss:$8 sps:$4 sm:$0xff]   ;;  %v1517_v51 = vsub.s32 0, %v129_v50  ;;  %v1519_v53 = vsub.s32 1, %v129_v50 }
  0x46   :  { %374 = vmatprep.subr.bf16.mxu1 %v1230_v11  ;;  %1165 = vmatprep.subr.bf16.mxu0 %v1269_v39  ;;  %v1272_v42 = vld [vmem:[#allocation5 + $0x130] ss:$8 sps:$4 sm:$0xff]   ;;  %v1273_v43 = vld [vmem:[#allocation5 + $0x1c0] ss:$8 sps:$4 sm:$0xff]   ;;  %v1312_v37 = vld [vmem:[#allocation5 + $0x2a4] ss:$8 sps:$4 sm:$0xff]  }
  0x47   :  { %v1274_v44 = vld [vmem:[#allocation5 + $0x140] ss:$8 sps:$4 sm:$0xff]   ;;  %v1275_v45 = vld [vmem:[#allocation5 + $0x1d0] ss:$8 sps:$4 sm:$0xff]   ;;  %v1315_v39 = vld [vmem:[#allocation5 + $0x2b4] ss:$8 sps:$4 sm:$0xff]  }
  0x48   :  { %v1276_v46 = vld [vmem:[#allocation5 + $0x150] ss:$8 sps:$4 sm:$0xff]   ;;  %v1277_v47 = vld [vmem:[#allocation5 + $0x1e0] ss:$8 sps:$4 sm:$0xff]   ;;  %v1330_v49 = vld [vmem:[#allocation5 + $0x304] ss:$8 sps:$4 sm:$0xff]  }
  0x49   :  { %375 = vmatpush1.bf16.msra.mxu1 %v1228_v12  ;;  %1166 = vmatpush3.bf16.msra.mxu0 %v1270_v40  ;;  %v1278_v48 = vld [vmem:[#allocation5 + $0x160] ss:$8 sps:$4 sm:$0xff]   ;;  %v1279_v3 = vld [vmem:[#allocation5 + $0x1f0] ss:$8 sps:$4 sm:$0xff]   ;;  %s1416_s26 = scalar_lea.vmem %s1048_s25, 256 }
  0x4a   :  { %376 = vmatprep.subr.bf16.mxu1 %v1233_v13  ;;  %1167 = vmatprep.subr.bf16.mxu0 %v1271_v41  ;;  %v123_v52 = vld [vmem:[#allocation7] ss:$8 sm:$0x3]  ;;  %v1280_v5 = vld [vmem:[#allocation5 + $0x170] ss:$8 sps:$4 sm:$0xff]   ;;  %p1417_p10 = scmp.ne.s32.totalorder %s1048_s25, %s1416_s26  ;;  %p1422_p12 = scmp.lt.s32.totalorder %s1416_s26, %s1416_s26 }
  0x4b   :  { %v131_v54 = vrot.slane %v123_v52, %v1517_v51  ;;  %v135_v55 = vrot.slane %v123_v52, %v1519_v53  ;;  %v1281_v6 = vld [vmem:[#allocation5 + $0x200] ss:$8 sps:$4 sm:$0xff]   ;;  %v1313_v40 = vld [vmem:[#allocation5 + $0x2b0] ss:$8 sps:$4 sm:$0xff]   ;;  %v1318_v41 = vld [vmem:[#allocation5 + $0x2c4] ss:$8 sps:$4 sm:$0xff]  }
  0x4c   :  { %v1282_v7 = vld [vmem:[#allocation5 + $0x180] ss:$8 sps:$4 sm:$0xff]   ;;  %v1333_v52 = vld [vmem:[#allocation5 + $0x314] ss:$8 sps:$4 sm:$0xff]   ;;  %p1423_p13 = por %p1422_p12, %p1421_p11 }
  0x4d   :  { %377 = vmatpush1.bf16.msra.mxu1 %v1231_v14  ;;  %1168 = vmatpush3.bf16.msra.mxu0 %v1272_v42  ;;  %v125_v9 = vld [vmem:[#allocation7 + $0x1] ss:$8 sm:$0x3] }
  0x4e   :  { %378 = vmatprep.subr.bf16.mxu1 %v1236_v15  ;;  %1169 = vmatprep.subr.bf16.mxu0 %v1273_v43  ;;  %v201_v10 = vrot.slane %v125_v9, %v1517_v51  ;;  %v205_v11 = vrot.slane %v125_v9, %v1519_v53  ;;  %v1310_v38 = vld [vmem:[#allocation5 + $0x2a0] ss:$8 sps:$4 sm:$0xff]   ;;  %v1321_v43 = vld [vmem:[#allocation5 + $0x2d4] ss:$8 sps:$4 sm:$0xff]   ;;  %p1424_p0 = pnand %p1423_p13, %p1417_p10 }
  0x4f   :  { %v1316_v42 = vld [vmem:[#allocation5 + $0x2c0] ss:$8 sps:$4 sm:$0xff]  }
  0x50   :  { %v1328_v50 = vld [vmem:[#allocation5 + $0x300] ss:$8 sps:$4 sm:$0xff]  }
  0x51   :  { %379 = vmatpush1.bf16.msra.mxu1 %v1234_v16  ;;  %1170 = vmatpush3.bf16.msra.mxu0 %v1274_v44  ;;  %v1319_v44 = vld [vmem:[#allocation5 + $0x2d0] ss:$8 sps:$4 sm:$0xff]  }
  0x52   :  { %380 = vmatprep.subr.bf16.mxu1 %v1239_v17  ;;  %1171 = vmatprep.subr.bf16.mxu0 %v1275_v45  ;;  %v1324_v45 = vld [vmem:[#allocation5 + $0x2e4] ss:$8 sps:$4 sm:$0xff]  }
  0x55   :  { %381 = vmatpush1.bf16.msra.mxu1 %v1237_v18  ;;  %1172 = vmatpush3.bf16.msra.mxu0 %v1276_v46  ;;  %v1322_v46 = vld [vmem:[#allocation5 + $0x2e0] ss:$8 sps:$4 sm:$0xff]  }
  0x56   :  { %382 = vmatprep.subr.bf16.mxu1 %v1242_v19  ;;  %1173 = vmatprep.subr.bf16.mxu0 %v1277_v47  ;;  %v1327_v47 = vld [vmem:[#allocation5 + $0x2f4] ss:$8 sps:$4 sm:$0xff]  }
  0x59   :  { %383 = vmatpush1.bf16.msra.mxu1 %v1240_v20  ;;  %1174 = vmatpush3.bf16.msra.mxu0 %v1278_v48  ;;  %v1325_v48 = vld [vmem:[#allocation5 + $0x2f0] ss:$8 sps:$4 sm:$0xff]  }
  0x5a   :  { %384 = vmatprep.subr.bf16.mxu1 %v1245_v21  ;;  %1175 = vmatprep.subr.bf16.mxu0 %v1279_v3  ;;  %v1283_v21 = vld [vmem:[#allocation5 + $0x210] ss:$8 sps:$4 sm:$0xff]  }
  0x5b   :  { %v1345_v3 = vld [vmem:[#allocation5 + $0x370] ss:$8 sps:$4 sm:$0xff]  }
  0x5d   :  { %385 = vmatpush1.bf16.msra.mxu1 %v1243_v22  ;;  %1176 = vmatpush3.bf16.msra.mxu0 %v1280_v5 }
  0x5e   :  { %386 = vmatprep.subr.bf16.mxu1 %v1248_v23  ;;  %1177 = vmatprep.subr.bf16.mxu0 %v1281_v6  ;;  %v1288_v23 = vld [vmem:[#allocation5 + $0x224] ss:$8 sps:$4 sm:$0xff]   ;;  %v126_v6 = vld [vmem:[#allocation7 + $0x2] ss:$0 sm:$0xff] }
  0x61   :  { %387 = vmatpush1.bf16.msra.mxu1 %v1246_v24  ;;  %1178 = vmatpush3.bf16.msra.mxu0 %v1282_v7  ;;  %v1286_v24 = vld [vmem:[#allocation5 + $0x220] ss:$8 sps:$4 sm:$0xff]  }
  0x62   :  { %388 = vmatprep.subr.bf16.mxu1 %v1251_v25  ;;  %643 = vmatprep.subr.bf16.mxu0 %v1285_v8  ;;  %v1291_v25 = vld [vmem:[#allocation5 + $0x234] ss:$8 sps:$4 sm:$0xff]  }
  0x65   :  { %389 = vmatpush1.bf16.msra.mxu1 %v1249_v26  ;;  %v1289_v26 = vld [vmem:[#allocation5 + $0x230] ss:$8 sps:$4 sm:$0xff]  }
  0x66   :  { %390 = vmatprep.subr.bf16.mxu1 %v1254_v27  ;;  %v1294_v27 = vld [vmem:[#allocation5 + $0x244] ss:$8 sps:$4 sm:$0xff]  }
  0x69   :  { %391 = vmatpush1.bf16.msra.mxu1 %v1252_v28  ;;  %v1292_v28 = vld [vmem:[#allocation5 + $0x240] ss:$8 sps:$4 sm:$0xff]  }
  0x6a   :  { %392 = vmatprep.subr.bf16.mxu1 %v1257_v29  ;;  %v1297_v29 = vld [vmem:[#allocation5 + $0x254] ss:$8 sps:$4 sm:$0xff]  }
  0x6d   :  { %393 = vmatpush1.bf16.msra.mxu1 %v1255_v30  ;;  %v1295_v30 = vld [vmem:[#allocation5 + $0x250] ss:$8 sps:$4 sm:$0xff]  }
  0x6e   :  { %394 = vmatprep.subr.bf16.mxu1 %v1260_v31  ;;  %v1300_v31 = vld [vmem:[#allocation5 + $0x264] ss:$8 sps:$4 sm:$0xff]  }
  0x71   :  { %395 = vmatpush1.bf16.msra.mxu1 %v1258_v32  ;;  %v1303_v32 = vld [vmem:[#allocation5 + $0x274] ss:$8 sps:$4 sm:$0xff]  }
  0x72   :  { %396 = vmatprep.subr.bf16.mxu1 %v1263_v33  ;;  %v1301_v33 = vld [vmem:[#allocation5 + $0x270] ss:$8 sps:$4 sm:$0xff]  }
  0x75   :  { %397 = vmatpush1.bf16.msra.mxu1 %v1261_v34  ;;  %v1304_v34 = vld [vmem:[#allocation5 + $0x280] ss:$8 sps:$4 sm:$0xff]  }
  0x76   :  { %398 = vmatprep.subr.bf16.mxu1 %v1266_v35  ;;  %v1309_v35 = vld [vmem:[#allocation5 + $0x294] ss:$8 sps:$4 sm:$0xff]  }
  0x79   :  { %399 = vmatpush1.bf16.msra.mxu1 %v1264_v36  ;;  %v1307_v36 = vld [vmem:[#allocation5 + $0x290] ss:$8 sps:$4 sm:$0xff]  }
 0x10f   :  { %v186_v56 = vpop.f32.mrb[0].mxu1 }
 0x110   :  { %v187_v57 = vadd.f32 %v186_v56, %v131_v54  ;;  %v188_v58 = vpop.f32.mrb[1].mxu1  ;;  %v1331_v54 = vld [vmem:[#allocation5 + $0x310] ss:$8 sps:$4 sm:$0xff]   ;;  %v1335_v56 = vld [vmem:[#allocation5 + $0x320] ss:$8 sps:$4 sm:$0xff]  }
 0x111   :  { %v189_v59 = vadd.f32 %v188_v58, %v135_v55  ;;  %v190_v60 = vpop.f32.mrb[2].mxu1  ;;  %v1334_v55 = vld [vmem:[#allocation5 + $0x3a0] ss:$8 sps:$4 sm:$0xff]   ;;  %v1337_v58 = vld [vmem:[#allocation5 + $0x330] ss:$8 sps:$4 sm:$0xff]  }
 0x112   :  { %v193_v61 = vmax.f32 %v187_v57, 0.0  ;;  %v191_v62 = vpop.f32.mrb[3].mxu1  ;;  %v1336_v57 = vld [vmem:[#allocation5 + $0x3b0] ss:$8 sps:$4 sm:$0xff]   ;;  %1185 = vmatprep.subr.bf16.mxu1 %v1334_v55  ;;  %v1339_v60 = vld [vmem:[#allocation5 + $0x340] ss:$8 sps:$4 sm:$0xff]  }
 0x113   :  { %v194_v63 = vmax.f32 %v189_v59, 0.0  ;;  %v1338_v59 = vld [vmem:[#allocation5 + $0x3c0] ss:$8 sps:$4 sm:$0xff]   ;;  %v1341_v62 = vld [vmem:[#allocation5 + $0x350] ss:$8 sps:$4 sm:$0xff]  }
 0x114   :  { %v195_v2 = vpack.c.bf16 %v193_v61, %v193_v61  ;;  %v1340_v61 = vld [vmem:[#allocation5 + $0x3d0] ss:$8 sps:$4 sm:$0xff]  }
 0x115   :  { %v196_v1 = vpack.c.bf16 %v194_v63, %v194_v63  ;;  %v1342_v63 = vld [vmem:[#allocation5 + $0x3e0] ss:$8 sps:$4 sm:$0xff]  }
 0x117   :  { %400 = vmatprep.mubr.bf16.mxu1 %v196_v1  ;;  %v1343_v1 = vld [vmem:[#allocation5 + $0x360] ss:$8 sps:$4 sm:$0xff]  }
 0x118   :  { %401 = vmatmul.mubr.bf16.vlgmr.msra.gmra.mrb[4].mxu1 %v195_v2  ;;  %v1344_v2 = vld [vmem:[#allocation5 + $0x3f0] ss:$8 sps:$4 sm:$0xff]  }
 0x119   :  { %1186 = vmatpush3.bf16.msra.mxu1 %v1335_v56 }
 0x11a   :  { %1187 = vmatprep.subr.bf16.mxu1 %v1336_v57 }
 0x11d   :  { %1188 = vmatpush3.bf16.msra.mxu1 %v1337_v58 }
 0x11e   :  { %1189 = vmatprep.subr.bf16.mxu1 %v1338_v59 }
 0x121   :  { %1190 = vmatpush3.bf16.msra.mxu1 %v1339_v60 }
 0x122   :  { %1191 = vmatprep.subr.bf16.mxu1 %v1340_v61 }
 0x125   :  { %1192 = vmatpush3.bf16.msra.mxu1 %v1341_v62 }
 0x126   :  { %1193 = vmatprep.subr.bf16.mxu1 %v1342_v63 }
 0x129   :  { %1194 = vmatpush3.bf16.msra.mxu1 %v1343_v1 }
 0x12a   :  { %1195 = vmatprep.subr.bf16.mxu1 %v1344_v2 }
 0x12d   :  { %1196 = vmatpush3.bf16.msra.mxu1 %v1345_v3 }
 0x1eb   :  { %v402_v12 = vpop.f32.mrb[4].mxu1 }
 0x1ec   :  { %v403_v13 = vadd.f32 %v402_v12, %v201_v10  ;;  %v404_v14 = vpop.f32.mrb[5].mxu1  ;;  %v618_v10 = vld [vmem:[#allocation7 + $0x10] ss:$8 sm:$0x3] }
 0x1ed   :  { %v405_v15 = vadd.f32 %v404_v14, %v205_v11  ;;  %v406_v16 = vpop.f32.mrb[6].mxu1  ;;  %v630_v14 = vrot.slane %v618_v10, %v1519_v53 }
 0x1ee   :  { %v409_v17 = vmax.f32 %v403_v13, 0.0  ;;  %v407_v18 = vpop.f32.mrb[7].mxu1  ;;  %v626_v13 = vrot.slane %v618_v10, %v1517_v51 }
 0x1ef   :  { %v410_v19 = vmax.f32 %v405_v15, 0.0 }
 0x1f0   :  { %v411_v22 = vpack.c.bf16 %v409_v17, %v409_v17 }
 0x1f1   :  { %v412_v20 = vpack.c.bf16 %v410_v19, %v410_v19 }
 0x1f3   :  { %541 = vmatprep.mubr.bf16.mxu0 %v412_v20 }
 0x1f4   :  { %542 = vmatmul.mubr.bf16.vlgmr.msra.gmra.mrb[0].mxu0 %v411_v22 }
 0x1f5   :  { %644 = vmatpush1.bf16.msra.mxu0 %v1283_v21  ;;  %675 = vmatprep.mubr.bf16.mxu0 %v1451_v0  ;;  %v1298_v0 = vld [vmem:[#allocation5 + $0x260] ss:$8 sps:$4 sm:$0xff]  }
 0x1f6   :  { %859 = vmatprep.subr.bf16.mxu0 %v1288_v23 }
 0x1fc   :  { %1114 = vmatmul.mubr.msk.bf16.vlgmr.msra.gmra.mrb[4].mxu0 %vm148_vm0, %v1513_v4  ;;  %v1306_v4 = vld [vmem:[#allocation5 + $0x284] ss:$8 sps:$4 sm:$0xff]  }
 0x1fd   :  { %860 = vmatpush1.bf16.msra.mxu0 %v1286_v24 }
 0x1fe   :  { %861 = vmatprep.subr.bf16.mxu0 %v1291_v25  ;;  %v1346_v25 = vld [vmem:[#allocation5 + $0x400] ss:$8 sps:$4 sm:$0xff]  }
 0x1ff   :  { %1197 = vmatprep.subr.bf16.mxu1 %v1346_v25 }
 0x201   :  { %862 = vmatpush1.bf16.msra.mxu0 %v1289_v26  ;;  %v1347_v26 = vld [vmem:[#allocation5 + $0x380] ss:$8 sps:$4 sm:$0xff]  }
 0x202   :  { %863 = vmatprep.subr.bf16.mxu0 %v1294_v27  ;;  %1198 = vmatpush3.bf16.msra.mxu1 %v1347_v26  ;;  %v1348_v27 = vld [vmem:[#allocation5 + $0x410] ss:$8 sps:$4 sm:$0xff]  }
 0x203   :  { %1199 = vmatprep.subr.bf16.mxu1 %v1348_v27 }
 0x205   :  { %864 = vmatpush1.bf16.msra.mxu0 %v1292_v28  ;;  %v1349_v28 = vld [vmem:[#allocation5 + $0x390] ss:$8 sps:$4 sm:$0xff]  }
 0x206   :  { %865 = vmatprep.subr.bf16.mxu0 %v1297_v29  ;;  %1200 = vmatpush3.bf16.msra.mxu1 %v1349_v28  ;;  %v620_v29 = vld [vmem:[#allocation7 + $0x11] ss:$8 sm:$0x3] }
 0x209   :  { %866 = vmatpush1.bf16.msra.mxu0 %v1295_v30  ;;  %v692_v30 = vrot.slane %v620_v29, %v1517_v51 }
 0x20a   :  { %867 = vmatprep.subr.bf16.mxu0 %v1300_v31  ;;  %v696_v31 = vrot.slane %v620_v29, %v1519_v53 }
 0x20d   :  { %868 = vmatpush1.bf16.msra.mxu0 %v1298_v0 }
 0x20e   :  { %869 = vmatprep.subr.bf16.mxu0 %v1303_v32 }
 0x211   :  { %870 = vmatpush1.bf16.msra.mxu0 %v1301_v33 }
 0x212   :  { %871 = vmatprep.subr.bf16.mxu0 %v1306_v4 }
 0x215   :  { %872 = vmatpush1.bf16.msra.mxu0 %v1304_v34 }
 0x216   :  { %873 = vmatprep.subr.bf16.mxu0 %v1309_v35 }
 0x219   :  { %874 = vmatpush1.bf16.msra.mxu0 %v1307_v36 }
 0x21a   :  { %875 = vmatprep.subr.bf16.mxu0 %v1312_v37 }
 0x21d   :  { %876 = vmatpush1.bf16.msra.mxu0 %v1310_v38 }
 0x21e   :  { %877 = vmatprep.subr.bf16.mxu0 %v1315_v39 }
 0x221   :  { %878 = vmatpush1.bf16.msra.mxu0 %v1313_v40 }
 0x222   :  { %879 = vmatprep.subr.bf16.mxu0 %v1318_v41  ;;  %v621_v41 = vld [vmem:[#allocation7 + $0x12] ss:$0 sm:$0xff] }
 0x225   :  { %880 = vmatpush1.bf16.msra.mxu0 %v1316_v42 }
 0x226   :  { %881 = vmatprep.subr.bf16.mxu0 %v1321_v43 }
 0x229   :  { %882 = vmatpush1.bf16.msra.mxu0 %v1319_v44 }
 0x22a   :  { %883 = vmatprep.subr.bf16.mxu0 %v1324_v45 }
 0x22d   :  { %884 = vmatpush1.bf16.msra.mxu0 %v1322_v46 }
 0x22e   :  { %885 = vmatprep.subr.bf16.mxu0 %v1327_v47 }
 0x231   :  { %886 = vmatpush1.bf16.msra.mxu0 %v1325_v48 }
 0x232   :  { %887 = vmatprep.subr.bf16.mxu0 %v1330_v49 }
 0x235   :  { %888 = vmatpush1.bf16.msra.mxu0 %v1328_v50 }
 0x236   :  { %889 = vmatprep.subr.bf16.mxu0 %v1333_v52 }
 0x239   :  { %890 = vmatpush1.bf16.msra.mxu0 %v1331_v54 }
 0x2c7   :  { %v1179_v5 = vpop.f32.mrb[0].mxu0 }
 0x2c8   :  { %v1180_v7 = vpop.f32.mrb[1].mxu0 }
 0x2c9   :  { %v1181_v8 = vadd.f32 %v1180_v7, %v1179_v5  ;;  %v1182_v9 = vpop.f32.mrb[2].mxu0 }
 0x2ca   :  { %v1183_v11 = vpop.f32.mrb[3].mxu0 }
 0x2cb   :  { %v544_v12 = vadd.f32 %v1181_v8, %v126_v6 }
 0x2cd   :  { %549 = vst [vmem:[#allocation8] sm:$0xff] %v544_v12 }
 0x2cf   :  { %v677_v15 = vpop.f32.mrb[4].mxu0 }
 0x2d0   :  { %v678_v16 = vadd.f32 %v677_v15, %v626_v13  ;;  %v679_v17 = vpop.f32.mrb[5].mxu0 }
 0x2d1   :  { %v680_v18 = vadd.f32 %v679_v17, %v630_v14  ;;  %v681_v19 = vpop.f32.mrb[6].mxu0 }
 0x2d2   :  { %v684_v20 = vmax.f32 %v678_v16, 0.0  ;;  %v682_v21 = vpop.f32.mrb[7].mxu0 }
 0x2d3   :  { %v685_v22 = vmax.f32 %v680_v18, 0.0 }
 0x2d4   :  { %v686_v24 = vpack.c.bf16 %v684_v20, %v684_v20 }
 0x2d5   :  { %v687_v23 = vpack.c.bf16 %v685_v22, %v685_v22 }
 0x2d7   :  { %891 = vmatprep.mubr.bf16.mxu0 %v687_v23 }
 0x2d8   :  { %892 = vmatmul.mubr.bf16.vlgmr.msra.gmra.mrb[8].mxu0 %v686_v24 }
 0x3ab   :  { %v893_v0 = vpop.f32.mrb[8].mxu0 }
 0x3ac   :  { %v894_v32 = vadd.f32 %v893_v0, %v692_v30  ;;  %v895_v33 = vpop.f32.mrb[9].mxu0 }
 0x3ad   :  { %v896_v4 = vadd.f32 %v895_v33, %v696_v31  ;;  %v897_v34 = vpop.f32.mrb[10].mxu0 }
 0x3ae   :  { %v900_v35 = vmax.f32 %v894_v32, 0.0  ;;  %v898_v36 = vpop.f32.mrb[11].mxu0 }
 0x3af   :  { %v901_v37 = vmax.f32 %v896_v4, 0.0 }
 0x3b0   :  { %v902_v39 = vpack.c.bf16 %v900_v35, %v900_v35 }
 0x3b1   :  { %v903_v38 = vpack.c.bf16 %v901_v37, %v901_v37 }
 0x3b3   :  { %1032 = vmatprep.mubr.bf16.mxu1 %v903_v38 }
 0x3b4   :  { %1033 = vmatmul.mubr.bf16.vlgmr.msra.gmra.mrb[8].mxu1 %v902_v39 }
 0x487   :  { %v1201_v40 = vpop.f32.mrb[8].mxu1 }
 0x488   :  { %v1202_v42 = vpop.f32.mrb[9].mxu1 }
 0x489   :  { %v1203_v51 = vadd.f32 %v1202_v42, %v1201_v40  ;;  %v1204_v43 = vpop.f32.mrb[10].mxu1 }
 0x48a   :  { %v1205_v53 = vpop.f32.mrb[11].mxu1 }
 0x48b   :  { %v1035_v44 = vadd.f32 %v1203_v51, %v621_v41 }
 0x48d   :  { %1041 = vst [vmem:[#allocation8 + $0x8] sm:$0xff] %v1035_v44 }
 0x48e   :  { %1427 = shalt.err (!%p1424_p0)
}
 0x48f   :  { %s1428_s29 = scalar_lea.hbm %s1550_s3, 256 }
 0x490   :  { %p1429_p1 = scmp.ne.s32.totalorder %s1550_s3, %s1428_s29  ;;  %p1432_p2 = scmp.lt.u32.totalorder %s1428_s29, %s1550_s3 }
 0x492   :  { %p1434_p3 = pnand %p1432_p2, %p1429_p1 }
 0x494   :  { %1437 = shalt.err (!%p1434_p3)
}
 0x495   :  { %1053 = dma.vmem_to_hbm [thread:$0]  %s1048_s25, 256, %s1550_s3, [#allocation4], %s1445_s22, %s1445_s22, %s1446_s23  }
 0x496   :  { %1442 = dma.done.wait [#allocation4], 256  }
 0x497   :  { %1443 = vsyncadd [#allocation4], 4294967040 }
 0x498   :  { %1057 = vsyncpa [#allocation3], 1 }
 0x499   :  { %1058 = vsyncpa [#allocation6], 1 }
 0x49a   :  { %1059 = vsyncpa [#allocation4], 1 }

</bundles_post_ra>
